<compile_context>
chip_gen: v6e
topology: v6e:2x2x1
jax: 0.10.0
libtpu: 0.0.40
codegen_flags: <defaults>
</compile_context>

<pallas_src>
import math

import jax
import jax.numpy as jnp
from jax.experimental import pallas as pl
from jax.experimental.pallas import tpu as pltpu

BN_EPS = 1e-5


# ---------------------------------------------------------------------------
# Hardware-aware sizing helpers
# ---------------------------------------------------------------------------

def _tpu_vmem_capacity():
    try:
        return int(pltpu.get_tpu_info().vmem_capacity_bytes)
    except Exception:
        return 64 * 2 ** 20          # conservative default (v7x per-TC VMEM)


def _step_bytes(nb, H, W, cin, cout):
    hw = H * W
    return 4 * nb * (hw * (2 * cin + 2 * cout) + cin * (hw + 2 * (W + 1)))


def _choose_batch_block(N, H, W, cin, cout):
    """Largest batch block whose per-step footprint fits a per-generation
    budget; keeps >= 2 grid steps when possible so megacore can split them."""
    budget = _tpu_vmem_capacity() // 6      # double-buffered in/out + temps
    c = max(cin, cout)
    divisors = [d for d in range(1, N + 1) if N % d == 0]
    feasible = [d for d in divisors if _step_bytes(d, H, W, c, cout) <= budget]
    if not feasible:
        return 1
    multi_step = [d for d in feasible if N // d >= 2]
    return max(multi_step) if multi_step else max(feasible)


def _vmem_limit(step_bytes):
    cap = _tpu_vmem_capacity()
    want = max(32 * 2 ** 20, 8 * step_bytes)
    return int(min(int(cap * 0.85), want))


# ---------------------------------------------------------------------------
# Kernels
# ---------------------------------------------------------------------------

def _make_conv_kernel(H, W, Cin, Cout, Nb, apply_preact, compute_dtype):
    """3x3 conv over whole image(s) in channels-major (C, H*W) layout.

    Zero padding is synthesized in-register: the flat spatial axis is padded
    with W+1 zero lanes on both sides, each of the 9 taps is a statically
    shifted window of that padded row, and the row-wrap positions are masked
    with an iota column test.  If `apply_preact` is set, the previous layer's
    folded BatchNorm affine + ReLU is applied (lane-dense) to the incoming
    block first.  Partial sums / sums-of-squares of this layer's raw output
    are emitted for the wrapper-side BN statistics (single fused pass).
    """
    HW = H * W
    PAD = W + 1

    def body(x_ref, w_ref, b_ref, scale_ref, shift_ref,
             z_ref, psum_ref, psq_ref):
        a = x_ref[...]                                     # (Nb, Cin, HW) f32
        if apply_preact:
            a = jnp.maximum(a * scale_ref[...] + shift_ref[...], 0.0)

        col = jax.lax.broadcasted_iota(jnp.int32, (Cin, HW), 1) % W
        zpad = jnp.zeros((Cin, PAD), jnp.float32)
        ssum = jnp.zeros((Cout, 1), jnp.float32)
        ssq = jnp.zeros((Cout, 1), jnp.float32)

        for b in range(Nb):
            ab = a[b]                                      # (Cin, HW)
            ap = jnp.concatenate([zpad, ab, zpad], axis=-1)
            acc = jnp.zeros((Cout, HW), jnp.float32)
            for dh in range(3):
                for dw in range(3):
                    off = PAD + (dh - 1) * W + (dw - 1)
                    tap = ap[:, off:off + HW]              # shifted window
                    if dw != 1:                            # mask row wrap
                        wv = col + (dw - 1)
                        tap = jnp.where((wv >= 0) & (wv < W), tap, 0.0)
                    acc = acc + jnp.dot(
                        w_ref[3 * dh + dw].astype(compute_dtype),
                        tap.astype(compute_dtype),
                        preferred_element_type=jnp.float32)
            zb = acc + b_ref[...]                          # (Cout, HW) f32
            z_ref[b] = zb
            ssum = ssum + jnp.sum(zb, axis=-1, keepdims=True)
            ssq = ssq + jnp.sum(zb * zb, axis=-1, keepdims=True)

        psum_ref[0] = ssum
        psq_ref[0] = ssq

    if apply_preact:
        return body

    def body_noact(x_ref, w_ref, b_ref, z_ref, psum_ref, psq_ref):
        return body(x_ref, w_ref, b_ref, None, None, z_ref, psum_ref, psq_ref)

    return body_noact


def _make_pool_kernel(H, W, C, Nb):
    """BN(folded affine) + ReLU + 2x2/stride-2 max pool, channels-major.

    The 2x2 max is shift+max on the flat spatial lanes; the even-(row,col)
    anchors are then gathered with a constant 0/1 selection matmul, so no
    scratch round-trip and every store stays lane-dense.
    """
    HW = H * W
    PAD = W + 1

    def body(z_ref, scale_ref, shift_ref, sel_ref, feat_ref, pool_ref):
        y = jnp.maximum(z_ref[...] * scale_ref[...] + shift_ref[...], 0.0)
        feat_ref[...] = y                                  # (Nb, C, HW)
        sel = sel_ref[...]                                 # (HW, Ho*Wo) 0/1
        for b in range(Nb):
            yb = y[b]                                      # (C, HW)
            yp = jnp.concatenate([yb, jnp.zeros((C, PAD), jnp.float32)],
                                 axis=-1)
            q = yb
            for d in (1, W, W + 1):                        # 2x2 window max
                q = jnp.maximum(q, yp[:, d:d + HW])
            pool_ref[b] = jnp.dot(q, sel,
                                  preferred_element_type=jnp.float32)

    return body


# ---------------------------------------------------------------------------
# Staged wrappers
# ---------------------------------------------------------------------------

def _conv_stage(x, w9, bias, scale, shift, *, H, W, nb, compute_dtype):
    """One Conv3x3 layer (optionally fused with the previous layer's BN+ReLU).
    Returns the raw conv output plus per-step partial BN statistics."""
    N, Cin, HW = x.shape
    Cout = w9.shape[1]
    G = N // nb
    apply_preact = scale is not None

    kernel = _make_conv_kernel(H, W, Cin, Cout, nb, apply_preact,
                               compute_dtype)

    in_specs = [
        pl.BlockSpec((nb, Cin, HW), lambda g: (g, 0, 0)),
        pl.BlockSpec((9, Cout, Cin), lambda g: (0, 0, 0)),
        pl.BlockSpec((Cout, 1), lambda g: (0, 0)),
    ]
    operands = [x, w9, bias]
    if apply_preact:
        in_specs += [pl.BlockSpec((Cin, 1), lambda g: (0, 0)),
                     pl.BlockSpec((Cin, 1), lambda g: (0, 0))]
        operands += [scale, shift]

    z, psum, psq = pl.pallas_call(
        kernel,
        grid=(G,),
        in_specs=in_specs,
        out_specs=(
            pl.BlockSpec((nb, Cout, HW), lambda g: (g, 0, 0)),
            pl.BlockSpec((1, Cout, 1), lambda g: (g, 0, 0)),
            pl.BlockSpec((1, Cout, 1), lambda g: (g, 0, 0)),
        ),
        out_shape=(
            jax.ShapeDtypeStruct((N, Cout, HW), jnp.float32),
            jax.ShapeDtypeStruct((G, Cout, 1), jnp.float32),
            jax.ShapeDtypeStruct((G, Cout, 1), jnp.float32),
        ),
        compiler_params=pltpu.CompilerParams(
            dimension_semantics=("parallel",),
            vmem_limit_bytes=_vmem_limit(
                _step_bytes(nb, H, W, max(Cin, Cout), Cout))),
    )(*operands)
    return z, psum, psq


def _pool_select_matrix(H, W):
    Ho, Wo = H // 2, W // 2
    l = jnp.arange(H * W)[:, None]
    k = jnp.arange(Ho * Wo)[None, :]
    anchor = 2 * (k // Wo) * W + 2 * (k % Wo)
    return (l == anchor).astype(jnp.float32)


def _bn_relu_pool_stage(z, scale, shift, *, H, W, nb):
    N, C, HW = z.shape
    Ho, Wo = H // 2, W // 2
    G = N // nb
    sel = _pool_select_matrix(H, W)
    kernel = _make_pool_kernel(H, W, C, nb)

    feat, pool = pl.pallas_call(
        kernel,
        grid=(G,),
        in_specs=[
            pl.BlockSpec((nb, C, HW), lambda g: (g, 0, 0)),
            pl.BlockSpec((C, 1), lambda g: (0, 0)),
            pl.BlockSpec((C, 1), lambda g: (0, 0)),
            pl.BlockSpec((HW, Ho * Wo), lambda g: (0, 0)),
        ],
        out_specs=(
            pl.BlockSpec((nb, C, HW), lambda g: (g, 0, 0)),
            pl.BlockSpec((nb, C, Ho * Wo), lambda g: (g, 0, 0)),
        ),
        out_shape=(
            jax.ShapeDtypeStruct((N, C, HW), jnp.float32),
            jax.ShapeDtypeStruct((N, C, Ho * Wo), jnp.float32),
        ),
        compiler_params=pltpu.CompilerParams(
            dimension_semantics=("parallel",),
            vmem_limit_bytes=_vmem_limit(4 * nb * C * HW * 3)),
    )(z, scale, shift, sel)
    return feat, pool


def _bn_affine(psum, psq, gamma, beta, count):
    total = jnp.sum(psum, axis=0)[:, 0]                    # (C,)
    total_sq = jnp.sum(psq, axis=0)[:, 0]
    mean = total / count
    # single-pass variance can cancel; clamp so rsqrt stays well-defined
    var = jnp.maximum(total_sq / count - mean * mean, 0.0)
    scale = gamma * jax.lax.rsqrt(var + BN_EPS)
    shift = beta - mean * scale
    return scale.reshape(-1, 1), shift.reshape(-1, 1)


# ---------------------------------------------------------------------------
# Public API
# ---------------------------------------------------------------------------

def init_encoder_params(key, in_channels, out_channels):
    """Parameter init mirroring nn.Conv2d / nn.BatchNorm2d defaults.
    Conv weights are stored as (9, Cout, Cin) with tap index t = 3*dh + dw."""
    k1, k2, k3, k4 = jax.random.split(key, 4)

    def conv_init(kw, kb, cin, cout):
        bound = 1.0 / math.sqrt(cin * 9)
        w = jax.random.uniform(kw, (9, cout, cin), jnp.float32, -bound, bound)
        b = jax.random.uniform(kb, (cout, 1), jnp.float32, -bound, bound)
        return w, b

    w1, b1 = conv_init(k1, k2, in_channels, out_channels)
    w2, b2 = conv_init(k3, k4, out_channels, out_channels)
    ones = jnp.ones((out_channels,), jnp.float32)
    zeros = jnp.zeros((out_channels,), jnp.float32)
    return dict(w1=w1, b1=b1, gamma1=ones, beta1=zeros,
                w2=w2, b2=b2, gamma2=ones, beta2=zeros)


def encoder_forward(x_nchw, params, compute_dtype=jnp.float32,
                    batch_block=None):
    """UNet3+ Encoder forward.  NCHW in -> (features_NCHW, pooled_NCHW).
    compute_dtype only affects the MXU operands (bf16 recommended on
    v6e/v7x); accumulation, statistics and elementwise math stay f32."""
    N, Cin, H, W = x_nchw.shape
    Cout = params["w1"].shape[1]
    assert H % 2 == 0 and W % 2 == 0, "even spatial dims required (2x2 pool)"
    HW = H * W

    # channels-major, flat spatial layout: pure reshape of NCHW (no transpose)
    x = x_nchw.reshape(N, Cin, HW).astype(jnp.float32)

    if batch_block is None:
        batch_block = _choose_batch_block(N, H, W, Cin, Cout)
    nb = batch_block
    assert N % nb == 0

    # conv1 (+ fused partial BN1 statistics)
    z1, s1, q1 = _conv_stage(x, params["w1"], params["b1"], None, None,
                             H=H, W=W, nb=nb, compute_dtype=compute_dtype)
    scale1, shift1 = _bn_affine(s1, q1, params["gamma1"], params["beta1"],
                                N * HW)

    # BN1 + ReLU fused into conv2 (+ fused partial BN2 statistics)
    z2, s2, q2 = _conv_stage(z1, params["w2"], params["b2"], scale1, shift1,
                             H=H, W=W, nb=nb, compute_dtype=compute_dtype)
    scale2, shift2 = _bn_affine(s2, q2, params["gamma2"], params["beta2"],
                                N * HW)

    feat, pool = _bn_relu_pool_stage(z2, scale2, shift2, H=H, W=W, nb=nb)

    return (feat.reshape(N, Cout, H, W),
            pool.reshape(N, Cout, H // 2, W // 2))


def encoder_reference(x_nchw, params):
    """Pure-JAX reference (XLA convs, same math) for correctness checking."""
    def conv_bn_relu(x, w9, b, g, be):
        cout, cin = w9.shape[1], w9.shape[2]
        w = jnp.transpose(w9.reshape(3, 3, cout, cin), (2, 3, 0, 1))  # OIHW
        y = jax.lax.conv_general_dilated(
            x, w, window_strides=(1, 1), padding=((1, 1), (1, 1)),
            dimension_numbers=("NCHW", "OIHW", "NCHW"),
            precision=jax.lax.Precision.HIGHEST)
        y = y + b.reshape(1, cout, 1, 1)
        mean = jnp.mean(y, axis=(0, 2, 3), keepdims=True)
        var = jnp.mean((y - mean) ** 2, axis=(0, 2, 3), keepdims=True)
        y = (y - mean) * jax.lax.rsqrt(var + BN_EPS)
        y = y * g.reshape(1, -1, 1, 1) + be.reshape(1, -1, 1, 1)
        return jnp.maximum(y, 0.0)

    y = conv_bn_relu(x_nchw.astype(jnp.float32), params["w1"], params["b1"],
                     params["gamma1"], params["beta1"])
    y = conv_bn_relu(y, params["w2"], params["b2"],
                     params["gamma2"], params["beta2"])
    N, C, H, W = y.shape
    pooled = jnp.max(y.reshape(N, C, H // 2, 2, W // 2, 2), axis=(3, 5))
    return y, pooled


if __name__ == "__main__":
    key = jax.random.PRNGKey(0)
    k_x, k_p = jax.random.split(key)

    N, Cin, H, W = 2, 4, 16, 16
    Cout = 8

    x = jax.random.normal(k_x, (N, Cin, H, W), dtype=jnp.float32)
    params = init_encoder_params(k_p, Cin, Cout)

    feat, pooled = encoder_forward(x, params)
    feat = jax.block_until_ready(feat)
    pooled = jax.block_until_ready(pooled)

    assert feat.shape == (N, Cout, H, W)
    assert pooled.shape == (N, Cout, H // 2, W // 2)

    ref_feat, ref_pool = encoder_reference(x, params)
    err_f = float(jnp.max(jnp.abs(feat - ref_feat)))
    err_p = float(jnp.max(jnp.abs(pooled - ref_pool)))
    assert jnp.allclose(feat, ref_feat, atol=1e-3, rtol=1e-3), \
        f"features mismatch, max err {err_f}"
    assert jnp.allclose(pooled, ref_pool, atol=1e-3, rtol=1e-3), \
        f"pooled mismatch, max err {err_p}"

    # bf16 MXU-operand path (v6e/v7x recommendation); f32 accumulation/stats,
    # so only a loose sanity bound against the f32 reference is expected.
    feat_bf, pool_bf = encoder_forward(x, params, compute_dtype=jnp.bfloat16)
    feat_bf = jax.block_until_ready(feat_bf)
    err_bf = float(jnp.max(jnp.abs(feat_bf - ref_feat)))
    assert err_bf < 0.5, f"bf16 path diverged, max err {err_bf}"

    print("KERNEL_OK")
</pallas_src>

<mosaic_0001>
module attributes {stable_mosaic.version = 11 : i64} {
  func.func @body_noact(%arg0: i32, %arg1: memref<1x4x256xf32, #tpu.memory_space<vmem>>, %arg2: memref<9x8x4xf32, #tpu.memory_space<vmem>>, %arg3: memref<8x1xf32, #tpu.memory_space<vmem>>, %arg4: memref<1x8x256xf32, #tpu.memory_space<vmem>>, %arg5: memref<1x8x1xf32, #tpu.memory_space<vmem>>, %arg6: memref<1x8x1xf32, #tpu.memory_space<vmem>>) attributes {dimension_semantics = [#tpu.dimension_semantics<parallel>], iteration_bounds = array<i64: 2>, scalar_prefetch = 0 : i64, scratch_operands = 0 : i64, tpu.core_type = #tpu.core_type<tc>, window_params = [{transform_indices = @transform_0, window_bounds = array<i64: 1, 4, 256>}, {pipeline_mode = #tpu.pipeline_mode<synchronous>, transform_indices = @transform_1, window_bounds = array<i64: 9, 8, 4>}, {pipeline_mode = #tpu.pipeline_mode<synchronous>, transform_indices = @transform_2, window_bounds = array<i64: 8, 1>}, {transform_indices = @transform_3, window_bounds = array<i64: 1, 8, 256>}, {transform_indices = @transform_4, window_bounds = array<i64: 1, 8, 1>}, {transform_indices = @transform_5, window_bounds = array<i64: 1, 8, 1>}]} {
    %c0 = arith.constant 0 : index
    %c0_0 = arith.constant 0 : index
    %c0_1 = arith.constant 0 : index
    %0 = vector.load %arg1[%c0, %c0_0, %c0_1] : memref<1x4x256xf32, #tpu.memory_space<vmem>>, vector<1x4x256xf32>
    %1 = tpu.iota {dimensions = array<i32: 1>} : vector<4x256xi32>
    %c16_i32 = arith.constant 16 : i32
    %c0_i32 = arith.constant 0 : i32
    %2 = arith.cmpi eq, %c16_i32, %c0_i32 : i32
    %c1_i32 = arith.constant 1 : i32
    %3 = arith.select %2, %c1_i32, %c16_i32 : i32
    %4 = vector.broadcast %3 : i32 to vector<4x256xi32>
    %5 = arith.remsi %1, %4 : vector<4x256xi32>
    %c0_i32_2 = arith.constant 0 : i32
    %6 = vector.broadcast %c0_i32_2 : i32 to vector<4x256xi32>
    %7 = arith.cmpi ne, %5, %6 : vector<4x256xi32>
    %c0_i32_3 = arith.constant 0 : i32
    %8 = vector.broadcast %c0_i32_3 : i32 to vector<4x256xi32>
    %9 = arith.cmpi slt, %5, %8 : vector<4x256xi32>
    %c0_i32_4 = arith.constant 0 : i32
    %10 = arith.cmpi slt, %3, %c0_i32_4 : i32
    %11 = vector.broadcast %10 : i1 to vector<4x256xi1>
    %12 = vector.broadcast %11 : vector<4x256xi1> to vector<4x256xi1>
    %13 = arith.xori %9, %12 : vector<4x256xi1>
    %14 = arith.andi %13, %7 : vector<4x256xi1>
    %15 = vector.broadcast %3 : i32 to vector<4x256xi32>
    %16 = arith.addi %5, %15 : vector<4x256xi32>
    %17 = arith.select %14, %16, %5 : vector<4x256xi1>, vector<4x256xi32>
    %cst = arith.constant 0.000000e+00 : f32
    %18 = vector.broadcast %cst : f32 to vector<4x17xf32>
    %cst_5 = arith.constant 0.000000e+00 : f32
    %19 = vector.broadcast %cst_5 : f32 to vector<8x1xf32>
    %cst_6 = arith.constant 0.000000e+00 : f32
    %20 = vector.broadcast %cst_6 : f32 to vector<8x1xf32>
    %21 = vector.shape_cast %0 : vector<1x4x256xf32> to vector<4x256xf32>
    %22 = tpu.concatenate %18, %21, %18 in 1 : vector<4x17xf32>, vector<4x256xf32>, vector<4x17xf32> -> vector<4x290xf32>
    %cst_7 = arith.constant 0.000000e+00 : f32
    %23 = vector.broadcast %cst_7 : f32 to vector<8x256xf32>
    %24 = vector.extract_strided_slice %22 {offsets = [0, 0], sizes = [4, 256], strides = [1, 1]} : vector<4x290xf32> to vector<4x256xf32>
    %c-1_i32 = arith.constant -1 : i32
    %25 = vector.broadcast %c-1_i32 : i32 to vector<4x256xi32>
    %26 = arith.addi %17, %25 : vector<4x256xi32>
    %c0_i32_8 = arith.constant 0 : i32
    %27 = vector.broadcast %c0_i32_8 : i32 to vector<4x256xi32>
    %28 = arith.cmpi sge, %26, %27 : vector<4x256xi32>
    %c16_i32_9 = arith.constant 16 : i32
    %29 = vector.broadcast %c16_i32_9 : i32 to vector<4x256xi32>
    %30 = arith.cmpi slt, %26, %29 : vector<4x256xi32>
    %31 = arith.andi %28, %30 : vector<4x256xi1>
    %cst_10 = arith.constant 0.000000e+00 : f32
    %32 = vector.broadcast %cst_10 : f32 to vector<4x256xf32>
    %33 = arith.select %31, %24, %32 : vector<4x256xi1>, vector<4x256xf32>
    %c0_11 = arith.constant 0 : index
    %c0_12 = arith.constant 0 : index
    %c0_13 = arith.constant 0 : index
    %34 = vector.load %arg2[%c0_11, %c0_12, %c0_13] : memref<9x8x4xf32, #tpu.memory_space<vmem>>, vector<1x8x4xf32>
    %35 = vector.shape_cast %34 : vector<1x8x4xf32> to vector<8x4xf32>
    %cst_14 = arith.constant dense<0.000000e+00> : vector<8x256xf32>
    %36 = tpu.matmul %35, %33, %cst_14 {dimension_numbers = #tpu.dot_dimension_numbers<[1], [0], [0], [1], [0, 0, 1, 1], [], []>} : vector<8x4xf32>, vector<4x256xf32>, vector<8x256xf32> -> vector<8x256xf32>
    %37 = arith.addf %23, %36 : vector<8x256xf32>
    %38 = vector.extract_strided_slice %22 {offsets = [0, 1], sizes = [4, 256], strides = [1, 1]} : vector<4x290xf32> to vector<4x256xf32>
    %c1 = arith.constant 1 : index
    %c0_15 = arith.constant 0 : index
    %c0_16 = arith.constant 0 : index
    %39 = vector.load %arg2[%c1, %c0_15, %c0_16] : memref<9x8x4xf32, #tpu.memory_space<vmem>>, vector<1x8x4xf32>
    %40 = vector.shape_cast %39 : vector<1x8x4xf32> to vector<8x4xf32>
    %cst_17 = arith.constant dense<0.000000e+00> : vector<8x256xf32>
    %41 = tpu.matmul %40, %38, %cst_17 {dimension_numbers = #tpu.dot_dimension_numbers<[1], [0], [0], [1], [0, 0, 1, 1], [], []>} : vector<8x4xf32>, vector<4x256xf32>, vector<8x256xf32> -> vector<8x256xf32>
    %42 = arith.addf %37, %41 : vector<8x256xf32>
    %43 = vector.extract_strided_slice %22 {offsets = [0, 2], sizes = [4, 256], strides = [1, 1]} : vector<4x290xf32> to vector<4x256xf32>
    %c1_i32_18 = arith.constant 1 : i32
    %44 = vector.broadcast %c1_i32_18 : i32 to vector<4x256xi32>
    %45 = arith.addi %17, %44 : vector<4x256xi32>
    %c0_i32_19 = arith.constant 0 : i32
    %46 = vector.broadcast %c0_i32_19 : i32 to vector<4x256xi32>
    %47 = arith.cmpi sge, %45, %46 : vector<4x256xi32>
    %c16_i32_20 = arith.constant 16 : i32
    %48 = vector.broadcast %c16_i32_20 : i32 to vector<4x256xi32>
    %49 = arith.cmpi slt, %45, %48 : vector<4x256xi32>
    %50 = arith.andi %47, %49 : vector<4x256xi1>
    %cst_21 = arith.constant 0.000000e+00 : f32
    %51 = vector.broadcast %cst_21 : f32 to vector<4x256xf32>
    %52 = arith.select %50, %43, %51 : vector<4x256xi1>, vector<4x256xf32>
    %c2 = arith.constant 2 : index
    %c0_22 = arith.constant 0 : index
    %c0_23 = arith.constant 0 : index
    %53 = vector.load %arg2[%c2, %c0_22, %c0_23] : memref<9x8x4xf32, #tpu.memory_space<vmem>>, vector<1x8x4xf32>
    %54 = vector.shape_cast %53 : vector<1x8x4xf32> to vector<8x4xf32>
    %cst_24 = arith.constant dense<0.000000e+00> : vector<8x256xf32>
    %55 = tpu.matmul %54, %52, %cst_24 {dimension_numbers = #tpu.dot_dimension_numbers<[1], [0], [0], [1], [0, 0, 1, 1], [], []>} : vector<8x4xf32>, vector<4x256xf32>, vector<8x256xf32> -> vector<8x256xf32>
    %56 = arith.addf %42, %55 : vector<8x256xf32>
    %57 = vector.extract_strided_slice %22 {offsets = [0, 16], sizes = [4, 256], strides = [1, 1]} : vector<4x290xf32> to vector<4x256xf32>
    %c-1_i32_25 = arith.constant -1 : i32
    %58 = vector.broadcast %c-1_i32_25 : i32 to vector<4x256xi32>
    %59 = arith.addi %17, %58 : vector<4x256xi32>
    %c0_i32_26 = arith.constant 0 : i32
    %60 = vector.broadcast %c0_i32_26 : i32 to vector<4x256xi32>
    %61 = arith.cmpi sge, %59, %60 : vector<4x256xi32>
    %c16_i32_27 = arith.constant 16 : i32
    %62 = vector.broadcast %c16_i32_27 : i32 to vector<4x256xi32>
    %63 = arith.cmpi slt, %59, %62 : vector<4x256xi32>
    %64 = arith.andi %61, %63 : vector<4x256xi1>
    %cst_28 = arith.constant 0.000000e+00 : f32
    %65 = vector.broadcast %cst_28 : f32 to vector<4x256xf32>
    %66 = arith.select %64, %57, %65 : vector<4x256xi1>, vector<4x256xf32>
    %c3 = arith.constant 3 : index
    %c0_29 = arith.constant 0 : index
    %c0_30 = arith.constant 0 : index
    %67 = vector.load %arg2[%c3, %c0_29, %c0_30] : memref<9x8x4xf32, #tpu.memory_space<vmem>>, vector<1x8x4xf32>
    %68 = vector.shape_cast %67 : vector<1x8x4xf32> to vector<8x4xf32>
    %cst_31 = arith.constant dense<0.000000e+00> : vector<8x256xf32>
    %69 = tpu.matmul %68, %66, %cst_31 {dimension_numbers = #tpu.dot_dimension_numbers<[1], [0], [0], [1], [0, 0, 1, 1], [], []>} : vector<8x4xf32>, vector<4x256xf32>, vector<8x256xf32> -> vector<8x256xf32>
    %70 = arith.addf %56, %69 : vector<8x256xf32>
    %71 = vector.extract_strided_slice %22 {offsets = [0, 17], sizes = [4, 256], strides = [1, 1]} : vector<4x290xf32> to vector<4x256xf32>
    %c4 = arith.constant 4 : index
    %c0_32 = arith.constant 0 : index
    %c0_33 = arith.constant 0 : index
    %72 = vector.load %arg2[%c4, %c0_32, %c0_33] : memref<9x8x4xf32, #tpu.memory_space<vmem>>, vector<1x8x4xf32>
    %73 = vector.shape_cast %72 : vector<1x8x4xf32> to vector<8x4xf32>
    %cst_34 = arith.constant dense<0.000000e+00> : vector<8x256xf32>
    %74 = tpu.matmul %73, %71, %cst_34 {dimension_numbers = #tpu.dot_dimension_numbers<[1], [0], [0], [1], [0, 0, 1, 1], [], []>} : vector<8x4xf32>, vector<4x256xf32>, vector<8x256xf32> -> vector<8x256xf32>
    %75 = arith.addf %70, %74 : vector<8x256xf32>
    %76 = vector.extract_strided_slice %22 {offsets = [0, 18], sizes = [4, 256], strides = [1, 1]} : vector<4x290xf32> to vector<4x256xf32>
    %c1_i32_35 = arith.constant 1 : i32
    %77 = vector.broadcast %c1_i32_35 : i32 to vector<4x256xi32>
    %78 = arith.addi %17, %77 : vector<4x256xi32>
    %c0_i32_36 = arith.constant 0 : i32
    %79 = vector.broadcast %c0_i32_36 : i32 to vector<4x256xi32>
    %80 = arith.cmpi sge, %78, %79 : vector<4x256xi32>
    %c16_i32_37 = arith.constant 16 : i32
    %81 = vector.broadcast %c16_i32_37 : i32 to vector<4x256xi32>
    %82 = arith.cmpi slt, %78, %81 : vector<4x256xi32>
    %83 = arith.andi %80, %82 : vector<4x256xi1>
    %cst_38 = arith.constant 0.000000e+00 : f32
    %84 = vector.broadcast %cst_38 : f32 to vector<4x256xf32>
    %85 = arith.select %83, %76, %84 : vector<4x256xi1>, vector<4x256xf32>
    %c5 = arith.constant 5 : index
    %c0_39 = arith.constant 0 : index
    %c0_40 = arith.constant 0 : index
    %86 = vector.load %arg2[%c5, %c0_39, %c0_40] : memref<9x8x4xf32, #tpu.memory_space<vmem>>, vector<1x8x4xf32>
    %87 = vector.shape_cast %86 : vector<1x8x4xf32> to vector<8x4xf32>
    %cst_41 = arith.constant dense<0.000000e+00> : vector<8x256xf32>
    %88 = tpu.matmul %87, %85, %cst_41 {dimension_numbers = #tpu.dot_dimension_numbers<[1], [0], [0], [1], [0, 0, 1, 1], [], []>} : vector<8x4xf32>, vector<4x256xf32>, vector<8x256xf32> -> vector<8x256xf32>
    %89 = arith.addf %75, %88 : vector<8x256xf32>
    %90 = vector.extract_strided_slice %22 {offsets = [0, 32], sizes = [4, 256], strides = [1, 1]} : vector<4x290xf32> to vector<4x256xf32>
    %c-1_i32_42 = arith.constant -1 : i32
    %91 = vector.broadcast %c-1_i32_42 : i32 to vector<4x256xi32>
    %92 = arith.addi %17, %91 : vector<4x256xi32>
    %c0_i32_43 = arith.constant 0 : i32
    %93 = vector.broadcast %c0_i32_43 : i32 to vector<4x256xi32>
    %94 = arith.cmpi sge, %92, %93 : vector<4x256xi32>
    %c16_i32_44 = arith.constant 16 : i32
    %95 = vector.broadcast %c16_i32_44 : i32 to vector<4x256xi32>
    %96 = arith.cmpi slt, %92, %95 : vector<4x256xi32>
    %97 = arith.andi %94, %96 : vector<4x256xi1>
    %cst_45 = arith.constant 0.000000e+00 : f32
    %98 = vector.broadcast %cst_45 : f32 to vector<4x256xf32>
    %99 = arith.select %97, %90, %98 : vector<4x256xi1>, vector<4x256xf32>
    %c6 = arith.constant 6 : index
    %c0_46 = arith.constant 0 : index
    %c0_47 = arith.constant 0 : index
    %100 = vector.load %arg2[%c6, %c0_46, %c0_47] : memref<9x8x4xf32, #tpu.memory_space<vmem>>, vector<1x8x4xf32>
    %101 = vector.shape_cast %100 : vector<1x8x4xf32> to vector<8x4xf32>
    %cst_48 = arith.constant dense<0.000000e+00> : vector<8x256xf32>
    %102 = tpu.matmul %101, %99, %cst_48 {dimension_numbers = #tpu.dot_dimension_numbers<[1], [0], [0], [1], [0, 0, 1, 1], [], []>} : vector<8x4xf32>, vector<4x256xf32>, vector<8x256xf32> -> vector<8x256xf32>
    %103 = arith.addf %89, %102 : vector<8x256xf32>
    %104 = vector.extract_strided_slice %22 {offsets = [0, 33], sizes = [4, 256], strides = [1, 1]} : vector<4x290xf32> to vector<4x256xf32>
    %c7 = arith.constant 7 : index
    %c0_49 = arith.constant 0 : index
    %c0_50 = arith.constant 0 : index
    %105 = vector.load %arg2[%c7, %c0_49, %c0_50] : memref<9x8x4xf32, #tpu.memory_space<vmem>>, vector<1x8x4xf32>
    %106 = vector.shape_cast %105 : vector<1x8x4xf32> to vector<8x4xf32>
    %cst_51 = arith.constant dense<0.000000e+00> : vector<8x256xf32>
    %107 = tpu.matmul %106, %104, %cst_51 {dimension_numbers = #tpu.dot_dimension_numbers<[1], [0], [0], [1], [0, 0, 1, 1], [], []>} : vector<8x4xf32>, vector<4x256xf32>, vector<8x256xf32> -> vector<8x256xf32>
    %108 = arith.addf %103, %107 : vector<8x256xf32>
    %109 = vector.extract_strided_slice %22 {offsets = [0, 34], sizes = [4, 256], strides = [1, 1]} : vector<4x290xf32> to vector<4x256xf32>
    %c1_i32_52 = arith.constant 1 : i32
    %110 = vector.broadcast %c1_i32_52 : i32 to vector<4x256xi32>
    %111 = arith.addi %17, %110 : vector<4x256xi32>
    %c0_i32_53 = arith.constant 0 : i32
    %112 = vector.broadcast %c0_i32_53 : i32 to vector<4x256xi32>
    %113 = arith.cmpi sge, %111, %112 : vector<4x256xi32>
    %c16_i32_54 = arith.constant 16 : i32
    %114 = vector.broadcast %c16_i32_54 : i32 to vector<4x256xi32>
    %115 = arith.cmpi slt, %111, %114 : vector<4x256xi32>
    %116 = arith.andi %113, %115 : vector<4x256xi1>
    %cst_55 = arith.constant 0.000000e+00 : f32
    %117 = vector.broadcast %cst_55 : f32 to vector<4x256xf32>
    %118 = arith.select %116, %109, %117 : vector<4x256xi1>, vector<4x256xf32>
    %c8 = arith.constant 8 : index
    %c0_56 = arith.constant 0 : index
    %c0_57 = arith.constant 0 : index
    %119 = vector.load %arg2[%c8, %c0_56, %c0_57] : memref<9x8x4xf32, #tpu.memory_space<vmem>>, vector<1x8x4xf32>
    %120 = vector.shape_cast %119 : vector<1x8x4xf32> to vector<8x4xf32>
    %cst_58 = arith.constant dense<0.000000e+00> : vector<8x256xf32>
    %121 = tpu.matmul %120, %118, %cst_58 {dimension_numbers = #tpu.dot_dimension_numbers<[1], [0], [0], [1], [0, 0, 1, 1], [], []>} : vector<8x4xf32>, vector<4x256xf32>, vector<8x256xf32> -> vector<8x256xf32>
    %122 = arith.addf %108, %121 : vector<8x256xf32>
    %c0_59 = arith.constant 0 : index
    %c0_60 = arith.constant 0 : index
    %123 = vector.load %arg3[%c0_59, %c0_60] : memref<8x1xf32, #tpu.memory_space<vmem>>, vector<8x1xf32>
    %124 = vector.broadcast %123 : vector<8x1xf32> to vector<8x256xf32>
    %125 = arith.addf %122, %124 : vector<8x256xf32>
    %c0_61 = arith.constant 0 : index
    %c0_62 = arith.constant 0 : index
    %c0_63 = arith.constant 0 : index
    %126 = vector.load %arg4[%c0_61, %c0_62, %c0_63] : memref<1x8x256xf32, #tpu.memory_space<vmem>>, vector<1x8x256xf32>
    %127 = vector.shape_cast %126 : vector<1x8x256xf32> to vector<8x256xf32>
    %128 = vector.shape_cast %125 : vector<8x256xf32> to vector<1x8x256xf32>
    tpu.vector_store %arg4[%c0_61, %c0_62, %c0_63], %128 {strides = array<i32>} : memref<1x8x256xf32, #tpu.memory_space<vmem>>, vector<1x8x256xf32>,
    %cst_64 = arith.constant dense<0.000000e+00> : vector<8xf32>
    %129 = vector.multi_reduction <add>, %125, %cst_64 [1] : vector<8x256xf32> to vector<8xf32>
    %130 = vector.shape_cast %129 : vector<8xf32> to vector<8x1xf32>
    %131 = arith.addf %19, %130 : vector<8x1xf32>
    %132 = arith.mulf %125, %125 : vector<8x256xf32>
    %cst_65 = arith.constant dense<0.000000e+00> : vector<8xf32>
    %133 = vector.multi_reduction <add>, %132, %cst_65 [1] : vector<8x256xf32> to vector<8xf32>
    %134 = vector.shape_cast %133 : vector<8xf32> to vector<8x1xf32>
    %135 = arith.addf %20, %134 : vector<8x1xf32>
    %c0_66 = arith.constant 0 : index
    %c0_67 = arith.constant 0 : index
    %c0_68 = arith.constant 0 : index
    %136 = vector.load %arg5[%c0_66, %c0_67, %c0_68] : memref<1x8x1xf32, #tpu.memory_space<vmem>>, vector<1x8x1xf32>
    %137 = vector.shape_cast %136 : vector<1x8x1xf32> to vector<8x1xf32>
    %138 = vector.shape_cast %131 : vector<8x1xf32> to vector<1x8x1xf32>
    tpu.vector_store %arg5[%c0_66, %c0_67, %c0_68], %138 {strides = array<i32>} : memref<1x8x1xf32, #tpu.memory_space<vmem>>, vector<1x8x1xf32>,
    %c0_69 = arith.constant 0 : index
    %c0_70 = arith.constant 0 : index
    %c0_71 = arith.constant 0 : index
    %139 = vector.load %arg6[%c0_69, %c0_70, %c0_71] : memref<1x8x1xf32, #tpu.memory_space<vmem>>, vector<1x8x1xf32>
    %140 = vector.shape_cast %139 : vector<1x8x1xf32> to vector<8x1xf32>
    %141 = vector.shape_cast %135 : vector<8x1xf32> to vector<1x8x1xf32>
    tpu.vector_store %arg6[%c0_69, %c0_70, %c0_71], %141 {strides = array<i32>} : memref<1x8x1xf32, #tpu.memory_space<vmem>>, vector<1x8x1xf32>,
    return
  }
  func.func @transform_0(%arg0: i32) -> (i32, i32, i32) {
    %c0_i32 = arith.constant 0 : i32
    %c0_i32_0 = arith.constant 0 : i32
    %c0_i32_1 = arith.constant 0 : i32
    return %arg0, %c0_i32, %c0_i32_0 : i32, i32, i32
  }
  func.func @transform_1(%arg0: i32) -> (i32, i32, i32) {
    %c0_i32 = arith.constant 0 : i32
    %c0_i32_0 = arith.constant 0 : i32
    %c0_i32_1 = arith.constant 0 : i32
    %c0_i32_2 = arith.constant 0 : i32
    return %c0_i32, %c0_i32_0, %c0_i32_1 : i32, i32, i32
  }
  func.func @transform_2(%arg0: i32) -> (i32, i32) {
    %c0_i32 = arith.constant 0 : i32
    %c0_i32_0 = arith.constant 0 : i32
    %c0_i32_1 = arith.constant 0 : i32
    return %c0_i32, %c0_i32_0 : i32, i32
  }
  func.func @transform_3(%arg0: i32) -> (i32, i32, i32) {
    %c0_i32 = arith.constant 0 : i32
    %c0_i32_0 = arith.constant 0 : i32
    %c0_i32_1 = arith.constant 0 : i32
    return %arg0, %c0_i32, %c0_i32_0 : i32, i32, i32
  }
  func.func @transform_4(%arg0: i32) -> (i32, i32, i32) {
    %c0_i32 = arith.constant 0 : i32
    %c0_i32_0 = arith.constant 0 : i32
    %c0_i32_1 = arith.constant 0 : i32
    return %arg0, %c0_i32, %c0_i32_0 : i32, i32, i32
  }
  func.func @transform_5(%arg0: i32) -> (i32, i32, i32) {
    %c0_i32 = arith.constant 0 : i32
    %c0_i32_0 = arith.constant 0 : i32
    %c0_i32_1 = arith.constant 0 : i32
    return %arg0, %c0_i32, %c0_i32_0 : i32, i32, i32
  }
}

</mosaic_0001>

<bundles_post_ra>
// kernel: tpu_custom_call.1
= control target key start
LH: loop header
LB: loop body
LE: loop exit
PB: predicated region body
PF: predicated region fallthrough
CT: control target
= control target key end

     0   :  { %11 = vsyncpa [#allocation3], 0  ;;  %s1743_s0 = inlined_call_operand.vmem [shape: f32[2,4,256], index: 0, kind: input, shape index: {}]   ;;  %s1744_s1 = inlined_call_operand.vmem [shape: f32[9,8,4], index: 1, kind: input, shape index: {}]   ;;  %s1745_s2 = inlined_call_operand.vmem [shape: f32[8,1], index: 2, kind: input, shape index: {}]   ;;  %s1746_s3 = inlined_call_operand.hbm [shape: f32[2,8,256], index: 3, kind: output, shape index: {0}]   ;;  %s1747_s4 = inlined_call_operand.vmem [shape: f32[2,8,1], index: 4, kind: output, shape index: {1}]   ;;  %s1748_s5 = inlined_call_operand.vmem [shape: f32[2,8,1], index: 5, kind: output, shape index: {2}]  }
   0x1   :  { %13 = vsyncpa [#allocation3 + $0x1], 0  ;;  %s1510_s18 = smov 0   ;;  %s1512_s19 = smov 0  }
   0x2   :  { %s1514_s20 = smov 0   ;;  %s1516_s21 = smov 0  }
   0x3 LB: > { %s1531_s22 = sadd.s32 4294967295, %s1466_s21   ;;  %s1303_s23 = sadd.s32 4294967294, %s1466_s21   ;;  %s1466_s21 = sphi %s1516_s21, %s1754_s21   ;;  %s1462_s20 = sphi %s1514_s20, %s1753_s20   ;;  %s1458_s19 = sphi %s1512_s19, %s1752_s19   ;;  %s1454_s18 = sphi %s1510_s18, %s1751_s18  }
   0x4   : > { %s1535_s24 = sadd.s32 1, %s1466_s21   ;;  %s94_s25 = sadd.s32 1, %s1462_s20 }
   0x5   : > { %s91_s26 = ssub.s32 %s1466_s21, %s1535_s24  ;;  %p104_p0 = scmp.ne.s32.totalorder %s1462_s20, %s1458_s19 }
   0x6   : > { %p92_p1 = scmp.eq.s32.totalorder %s91_s26, 0  ;;  %p105_p2 = scmp.eq.s32.totalorder %s1531_s22, 1 }
   0x7   : > { %p110_p3 = scmp.ne.s32.totalorder %s1458_s19, %s1454_s18  ;;  %p111_p4 = scmp.eq.s32.totalorder %s1303_s23, 1 }
   0x8   : > { %s1546_s27 = scalar_select %p92_p1, %s1462_s20, %s94_s25  }
   0x9   : > { %p1548_p5 = por %p105_p2, %p104_p0  ;;  %p1552_p6 = por %p111_p4, %p110_p3 }
   0xa   : > { %p1306_p7 = scmp.ge.s32.totalorder %s1466_s21, 1  ;;  %p195_p8 = scmp.lt.s32.totalorder %s1466_s21, 3 }
   0xc   : > { %p196_p9 = pnand %p1306_p7, %p195_p8 }
   0xd   : > { %p231_p10 = scmp.lt.s32.totalorder (!%p196_p9), %s1531_s22, 1  ;;  %s1468_s10 = smov (!%p196_p9), 17  }
   0xe   : > { %199 = sbr.rel (%p196_p9) target bundleno = 648 (0x288), region = 32  ;;  %s1469_s11 = smov (!%p196_p9), 126  }
   0xf   : > { %s1470_s12 = smov (!%p196_p9), 127   ;;  %s1471_s13 = smov (!%p196_p9), 111  }
  0x10   : > { %s1472_s14 = smov (!%p196_p9), 112   ;;  %s1473_s15 = smov (!%p196_p9), 96  }
  0x11   : > { %s1474_s16 = smov (!%p196_p9), 110   ;;  %s1476_s17 = smov (!%p196_p9), 95  }
  0x12   : > { %s1478_s26 = smov (!%p196_p9), 94   ;;  %s1479_s25 = smov (!%p196_p9), [#allocation2]  }
  0x13   : > { %s232_s30 = scalar_select %p231_p10, %s1531_s22, 1  ;;  %v245_v2 = vlaneseq  ;;  %vm278_vm0 = vcmask 138240   ;;  %vm313_vm2 = vcmask 1043456   ;;  %v1475_v15 = vmov 0.0   ;;  %v295_v16 = vld [vmem:[%s1744_s1] sm:$0xff]  ;;  %v1312_v33 = vld [vmem:[%s1744_s1 + $0x8] sm:$0xff] }
  0x14   : > { %382 = vmatprep.mubr.f32.mxu0 %v1475_v15  ;;  %462 = vmatprep.mubr.f32.mxu1 %v1475_v15  ;;  %vm309_vm4 = vcmask 31744   ;;  %v1477_v18 = vmov 0   ;;  %v1144_v19 = vld [vmem:[%s1745_s2] sm:$0xff]  ;;  %vm306_vm5 = vcmask 1039360   ;;  %vm483_vm6 = vcmask 1031168   ;;  %v1319_v41 = vld [vmem:[%s1744_s1 + $0x10] sm:$0xff] }
  0x15   : > { %s1560_s6 = sshll.u32 %s232_s30, 3  ;;  %v1566_v3 = vand.u32 127, %v245_v2  ;;  %1404 = vset.pattern.permute.xlu0 %v1477_v18  ;;  %vm580_vm9 = vcmask 916480   ;;  %vm679_vm10 = vcmask 908288   ;;  %v1323_v47 = vld [vmem:[%s1744_s1 + $0x18] sm:$0xff]  ;;  %vm768_vm11 = vcmask 900096  }
  0x16   : > { %s235_s9 = scalar_lea.vmem %s1743_s0, %s1560_s6  ;;  %v1327_v53 = vld [vmem:[%s1744_s1 + $0x20] sm:$0xff]  ;;  %vm865_vm12 = vcmask 785408   ;;  %v1331_v59 = vld [vmem:[%s1744_s1 + $0x28] sm:$0xff]  ;;  %vm964_vm13 = vcmask 777216   ;;  %vm1053_vm14 = vcmask 769024  }
  0x17   : > { %v244_v0 = vld [vmem:[%s235_s9] sm:$0xff]  ;;  %v1569_v4 = vadd.s32 128, %v1566_v3  ;;  %v252_v6 = vand.u32 15, %v1566_v3  ;;  %v1335_v3 = vld [vmem:[%s1744_s1 + $0x30] sm:$0xff]  ;;  %s216_s9 = sand.u32 1, %s1458_s19  }
  0x18   : > { %274 = vrot.lane.b32.xlu0 %v244_v0, %s1468_s10  ;;  %v273_v1 = vcombine.high %v244_v0, %v244_v0 }
  0x19   : > { %v259_v5 = vand.u32 15, %v1569_v4  ;;  %v1579_v9 = vadd.s32 4294967295, %v252_v6  ;;  %v1617_v28 = vadd.s32 1, %v252_v6  ;;  %v1339_v6 = vld [vmem:[%s1744_s1 + $0x38] sm:$0xff] }
  0x1b   : > { %v1575_v7 = vadd.s32 4294967295, %v259_v5  ;;  %vm287_vm3 = vcmp.ge.s32.totalorder %v1579_v9, 0  ;;  %v1621_v29 = vadd.s32 1, %v259_v5  ;;  %vm473_vm7 = vcmp.lt.s32.totalorder %v1617_v28, 16 }
  0x1c   : > { %276 = vrot.lane.b32.xlu0 %v273_v1, %s1468_s10  ;;  %s1307_s10 = sshll.u32 %s216_s9, 4 }
  0x1d   : > { %vm288_vm1 = vcmp.ge.s32.totalorder %v1575_v7, 0  ;;  %vm474_vm8 = vcmp.lt.s32.totalorder %v1621_v29, 16 }
  0x8a   : > { %v275_v8 = vpop.permute.xlu0 %274 }
  0x8b   : > { %v283_v10 = vsel %vm278_vm0, 0.0, %v275_v8 }
  0x8c   : > { %477 = vrot.lane.b32.xlu1 %v283_v10, %s1469_s11  ;;  %300 = vrot.lane.b32.xlu0 %v283_v10, %s1470_s12  ;;  %v293_v14 = vsel %vm287_vm3, %v283_v10, 0.0 }
  0x8e   : > { %v277_v11 = vpop.permute.xlu0 %276 }
  0x8f   : > { %v279_v12 = vsel %vm278_vm0, %v275_v8, %v277_v11  ;;  %v284_v17 = vsel %vm278_vm0, %v277_v11, 0.0 }
  0x90   : > { %673 = vrot.lane.b32.xlu1 %v283_v10, %s1471_s13  ;;  %574 = vrot.lane.b32.xlu0 %v283_v10, %s1472_s14  ;;  %v294_v13 = vsel %vm288_vm1, %v279_v12, 0.0 }
  0x91   : > { %1316 = vmatprep.subr.msk.mxu1 %vm313_vm2, %v294_v13 }
  0x92   : > { %1317 = vmatpush1.msk.msra.mxu1 %vm313_vm2, %v293_v14  ;;  %v1343_v14 = vld [vmem:[%s1744_s1 + $0x40] sm:$0xff] }
  0x93   : > { %1318 = vmatmul.mubr.msk.f32.vlgmr.msra.gmra.mxu1 %vm309_vm4, %v295_v16 }
  0x94   : > { %859 = vrot.lane.b32.xlu1 %v283_v10, %s1473_s15  ;;  %762 = vrot.lane.b32.xlu0 %v283_v10, %s1474_s16 }
  0x95   : > { %662 = vmatprep.mubr.f32.mxu1 %v1475_v15 }
  0x98   : > { %958 = vrot.lane.b32.xlu0 %v283_v10, %s1476_s17  ;;  %302 = vrot.lane.b32.xlu1 %v279_v12, %s1470_s12 }
  0x9c   : > { %481 = vrot.lane.b32.xlu0 %v284_v17, %s1469_s11  ;;  %304 = vrot.lane.b32.xlu1 %v284_v17, %s1470_s12  ;;  %s1353_s12 = sshll.u32 %s1531_s22, 8 }
  0xa0   : > { %576 = vrot.lane.b32.xlu0 %v279_v12, %s1472_s14  ;;  %479 = vrot.lane.b32.xlu1 %v279_v12, %s1469_s11  ;;  %s218_s11 = scalar_lea.vmem [#allocation2], %s1307_s10 }
  0xa4   : > { %677 = vrot.lane.b32.xlu0 %v284_v17, %s1471_s13  ;;  %578 = vrot.lane.b32.xlu1 %v284_v17, %s1472_s14 }
  0xa8   : > { %764 = vrot.lane.b32.xlu0 %v279_v12, %s1474_s16  ;;  %675 = vrot.lane.b32.xlu1 %v279_v12, %s1471_s13 }
  0xac   : > { %863 = vrot.lane.b32.xlu0 %v284_v17, %s1473_s15  ;;  %766 = vrot.lane.b32.xlu1 %v284_v17, %s1474_s16  ;;  %s1190_s16 = sshll.u32 %s218_s11, 4  ;;  %s1191_s16 = int_to_ptr.vmem [resolvable:$true] %s1190_s16 }
  0xad   : > { %s1406_s23 = scalar_lea.vmem %s1191_s16, 256 }
  0xae   : > { %p1407_p11 = scmp.ne.s32.totalorder %s1191_s16, %s1406_s23 }
  0xb0   : > { %960 = vrot.lane.b32.xlu0 %v279_v12, %s1476_s17  ;;  %861 = vrot.lane.b32.xlu1 %v279_v12, %s1473_s15  ;;  %s1188_s15 = scalar_lea.hbm %s1746_s3, %s1353_s12  ;;  %p1408_p12 = pnand %p1407_p11, %p1548_p5 }
  0xb2   : > { %p1409_p13 = pneg %p1408_p12 }
  0xb4   : > { %1051 = vrot.lane.b32.xlu0 %v284_v17, %s1478_s26  ;;  %962 = vrot.lane.b32.xlu1 %v284_v17, %s1476_s17  ;;  %s1168_s17 = scalar_lea.sflag [#allocation3], %s216_s9 }
  0xb8   : > { %1049 = vrot.lane.b32.xlu1 %v279_v12, %s1478_s26  ;;  %1147 = vperm.xlu0 %1404, %v1144_v19  }
  0xbc   : > { %1047 = vrot.lane.b32.xlu1 %v283_v10, %s1478_s26  ;;  %s1410_s26 = sshll.u32 %s1479_s25, 4  ;;  %s1411_s26 = int_to_ptr.vmem [resolvable:$false] %s1410_s26 }
  0xbd   : > { %s1412_s30 = scalar_lea.vmem %s1411_s26, 512  ;;  %p1413_p0 = scmp.lt.s32.totalorder %s1191_s16, %s1411_s26 }
  0xbe   : > { %p1414_p1 = scmp.lt.s32.totalorder %s1412_s30, %s1406_s23 }
  0xc0   : > { %p1415_p2 = por %p1414_p1, %p1413_p0 }
  0xc2   : > { %p1416_p3 = pnand %p1415_p2, %p1409_p13 }
  0xfe   : > { %v478_v20 = vpop.permute.xlu1 %477  ;;  %v301_v21 = vpop.permute.xlu0 %300 }
 0x102   : > { %v674_v22 = vpop.permute.xlu1 %673  ;;  %v575_v23 = vpop.permute.xlu0 %574 }
 0x106   : > { %v1611_v24 = vpop.permute.xlu1 %859  ;;  %v763_v25 = vpop.permute.xlu0 %762 }
 0x10a   : > { %v303_v26 = vpop.permute.xlu1 %302  ;;  %v1613_v27 = vpop.permute.xlu0 %958 }
 0x10b   : > { %v307_v34 = vsel %vm306_vm5, %v301_v21, %v303_v26 }
 0x10e   : > { %v305_v30 = vpop.permute.xlu1 %304  ;;  %v482_v31 = vpop.permute.xlu0 %481 }
 0x10f   : > { %v308_v32 = vsel %vm306_vm5, %v303_v26, %v305_v30 }
 0x110   : > { %1313 = vmatprep.subr.msk.mxu0 %vm313_vm2, %v308_v32 }
 0x111   : > { %1314 = vmatpush1.msk.msra.mxu0 %vm313_vm2, %v307_v34 }
 0x112   : > { %v480_v35 = vpop.permute.xlu1 %479  ;;  %v577_v36 = vpop.permute.xlu0 %576  ;;  %1315 = vmatmul.mubr.msk.f32.vlgmr.msra.gmra.mxu0 %vm309_vm4, %v1312_v33 }
 0x113   : > { %v484_v37 = vsel %vm483_vm6, %v478_v20, %v480_v35  ;;  %v485_v38 = vsel %vm483_vm6, %v480_v35, %v482_v31  ;;  %565 = vmatprep.mubr.f32.mxu0 %v1475_v15  ;;  %v581_v42 = vsel %vm580_vm9, %v575_v23, %v577_v36 }
 0x114   : > { %v488_v39 = vsel %vm473_vm7, %v484_v37, 0.0  ;;  %v489_v40 = vsel %vm474_vm8, %v485_v38, 0.0  ;;  %v585_v48 = vsel %vm287_vm3, %v581_v42, 0.0 }
 0x115   : > { %1320 = vmatprep.subr.msk.mxu0 %vm313_vm2, %v489_v40 }
 0x116   : > { %v579_v43 = vpop.permute.xlu1 %578  ;;  %1321 = vmatpush1.msk.msra.mxu0 %vm313_vm2, %v488_v39  ;;  %v678_v44 = vpop.permute.xlu0 %677 }
 0x117   : > { %v582_v45 = vsel %vm580_vm9, %v577_v36, %v579_v43  ;;  %1322 = vmatmul.mubr.msk.f32.vlgmr.msra.gmra.mxu0 %vm309_vm4, %v1319_v41 }
 0x118   : > { %v586_v46 = vsel %vm288_vm1, %v582_v45, 0.0  ;;  %753 = vmatprep.mubr.f32.mxu0 %v1475_v15 }
 0x119   : > { %1324 = vmatprep.subr.msk.mxu1 %vm313_vm2, %v586_v46 }
 0x11a   : > { %v676_v49 = vpop.permute.xlu1 %675  ;;  %1325 = vmatpush1.msk.msra.mxu1 %vm313_vm2, %v585_v48  ;;  %v765_v50 = vpop.permute.xlu0 %764 }
 0x11b   : > { %v680_v51 = vsel %vm679_vm10, %v674_v22, %v676_v49  ;;  %v681_v52 = vsel %vm679_vm10, %v676_v49, %v678_v44  ;;  %1326 = vmatmul.mubr.msk.f32.vlgmr.msra.gmra.mxu1 %vm309_vm4, %v1323_v47  ;;  %v769_v54 = vsel %vm768_vm11, %v763_v25, %v765_v50 }
 0x11c   : > { %1328 = vmatprep.subr.msk.mxu0 %vm313_vm2, %v681_v52  ;;  %850 = vmatprep.mubr.f32.mxu1 %v1475_v15  ;;  %v773_v60 = vsel %vm473_vm7, %v769_v54, 0.0 }
 0x11d   : > { %1329 = vmatpush1.msk.msra.mxu0 %vm313_vm2, %v680_v51 }
 0x11e   : > { %v767_v55 = vpop.permute.xlu1 %766  ;;  %v864_v56 = vpop.permute.xlu0 %863  ;;  %1330 = vmatmul.mubr.msk.f32.vlgmr.msra.gmra.mxu0 %vm309_vm4, %v1327_v53 }
 0x11f   : > { %v770_v57 = vsel %vm768_vm11, %v765_v50, %v767_v55  ;;  %947 = vmatprep.mubr.f32.mxu0 %v1475_v15 }
 0x120   : > { %v774_v58 = vsel %vm474_vm8, %v770_v57, 0.0 }
 0x121   : > { %1332 = vmatprep.subr.msk.mxu1 %vm313_vm2, %v774_v58 }
 0x122   : > { %v862_v61 = vpop.permute.xlu1 %861  ;;  %1333 = vmatpush1.msk.msra.mxu1 %vm313_vm2, %v773_v60  ;;  %v961_v2 = vpop.permute.xlu0 %960 }
 0x123   : > { %v866_v62 = vsel %vm865_vm12, %v1611_v24, %v862_v61  ;;  %v867_v63 = vsel %vm865_vm12, %v862_v61, %v864_v56  ;;  %1334 = vmatmul.mubr.msk.f32.vlgmr.msra.gmra.mxu1 %vm309_vm4, %v1331_v59  ;;  %v965_v7 = vsel %vm964_vm13, %v1613_v27, %v961_v2 }
 0x124   : > { %v870_v0 = vsel %vm287_vm3, %v866_v62, 0.0  ;;  %v871_v1 = vsel %vm288_vm1, %v867_v63, 0.0  ;;  %1038 = vmatprep.mubr.f32.mxu1 %v1475_v15 }
 0x125   : > { %1336 = vmatprep.subr.msk.mxu0 %vm313_vm2, %v871_v1 }
 0x126   : > { %v963_v4 = vpop.permute.xlu1 %962  ;;  %1337 = vmatpush1.msk.msra.mxu0 %vm313_vm2, %v870_v0  ;;  %v1052_v8 = vpop.permute.xlu0 %1051 }
 0x127   : > { %v966_v5 = vsel %vm964_vm13, %v961_v2, %v963_v4  ;;  %1338 = vmatmul.mubr.msk.f32.vlgmr.msra.gmra.mxu0 %vm309_vm4, %v1335_v3 }
 0x128   : > { %1340 = vmatprep.subr.msk.mxu1 %vm313_vm2, %v966_v5  ;;  %1135 = vmatprep.mubr.f32.mxu0 %v1475_v15 }
 0x129   : > { %1341 = vmatpush1.msk.msra.mxu1 %vm313_vm2, %v965_v7 }
 0x12a   : > { %v1050_v9 = vpop.permute.xlu1 %1049  ;;  %1342 = vmatmul.mubr.msk.f32.vlgmr.msra.gmra.mxu1 %vm309_vm4, %v1339_v6 }
 0x12b   : > { %v1055_v10 = vsel %vm1053_vm14, %v1050_v9, %v1052_v8 }
 0x12c   : > { %v1059_v11 = vsel %vm474_vm8, %v1055_v10, 0.0 }
 0x12d   : > { %1344 = vmatprep.subr.msk.mxu0 %vm313_vm2, %v1059_v11 }
 0x12e   : > { %v1048_v12 = vpop.permute.xlu1 %1047 }
 0x12f   : > { %v1054_v13 = vsel %vm1053_vm14, %v1048_v12, %v1050_v9 }
 0x130   : > { %v1058_v15 = vsel %vm473_vm7, %v1054_v13, 0.0 }
 0x131   : > { %1345 = vmatpush1.msk.msra.mxu0 %vm313_vm2, %v1058_v15 }
 0x132   : > { %1346 = vmatmul.mubr.msk.f32.vlgmr.msra.gmra.mxu0 %vm309_vm4, %v1343_v14 }
 0x133   : > { %v1148_v46 = vpop.permute.xlu0 %1147 }
 0x153   : > { %v464_v18 = vpop.f32.mrf.mxu1 }
 0x155   : > { %v466_v19 = vpop.f32.mrf.mxu1 }
 0x1d2   : > { %v384_v16 = vpop.f32.mrf.mxu0 }
 0x1d3   : > { %v465_v21 = vadd.f32 %v464_v18, %v384_v16 }
 0x1d4   : > { %v386_v17 = vpop.f32.mrf.mxu0 }
 0x1d5   : > { %v467_v22 = vadd.f32 %v466_v19, %v386_v17 }
 0x1d7   : > { %v567_v20 = vpop.f32.mrf.mxu0 }
 0x1d8   : > { %v572_v25 = vadd.f32 %v567_v20, %v465_v21 }
 0x1d9   : > { %v569_v23 = vpop.f32.mrf.mxu0 }
 0x1da   : > { %v573_v26 = vadd.f32 %v569_v23, %v467_v22 }
 0x1db   : > { %v664_v24 = vpop.f32.mrf.mxu1 }
 0x1dc   : > { %v669_v28 = vadd.f32 %v664_v24, %v572_v25 }
 0x1dd   : > { %v666_v27 = vpop.f32.mrf.mxu1 }
 0x1de   : > { %v755_v29 = vpop.f32.mrf.mxu0  ;;  %v670_v30 = vadd.f32 %v666_v27, %v573_v26 }
 0x1df   : > { %v760_v33 = vadd.f32 %v755_v29, %v669_v28 }
 0x1e0   : > { %v757_v31 = vpop.f32.mrf.mxu0 }
 0x1e1   : > { %v761_v34 = vadd.f32 %v757_v31, %v670_v30 }
 0x1e3   : > { %v852_v32 = vpop.f32.mrf.mxu1 }
 0x1e4   : > { %v857_v37 = vadd.f32 %v852_v32, %v760_v33 }
 0x1e5   : > { %v854_v35 = vpop.f32.mrf.mxu1 }
 0x1e6   : > { %v858_v38 = vadd.f32 %v854_v35, %v761_v34 }
 0x1e7   : > { %v949_v36 = vpop.f32.mrf.mxu0 }
 0x1e8   : > { %v954_v41 = vadd.f32 %v949_v36, %v857_v37 }
 0x1e9   : > { %v951_v39 = vpop.f32.mrf.mxu0 }
 0x1ea   : > { %v1040_v40 = vpop.f32.mrf.mxu1  ;;  %v955_v42 = vadd.f32 %v951_v39, %v858_v38 }
 0x1eb   : > { %v1045_v44 = vadd.f32 %v1040_v40, %v954_v41 }
 0x1ec   : > { %v1042_v43 = vpop.f32.mrf.mxu1 }
 0x1ed   : > { %v1046_v47 = vadd.f32 %v1042_v43, %v955_v42 }
 0x1f2   : > { %v1137_v45 = vpop.f32.mrf.mxu0 }
 0x1f3   : > { %v1142_v48 = vadd.f32 %v1137_v45, %v1045_v44 }
 0x1f4   : > { %v1139_v49 = vpop.f32.mrf.mxu0 }
 0x1f5   : > { %v1143_v50 = vadd.f32 %v1139_v49, %v1046_v47  ;;  %v1150_v51 = vadd.f32 %v1148_v46, %v1142_v48 }
 0x1f7   : > { %v1151_v52 = vadd.f32 %v1148_v46, %v1143_v50  ;;  %1152 = vst [vmem:[%s218_s11] sm:$0xff] %v1150_v51  ;;  %v1158_v54 = vmul.f32 %v1150_v51, %v1150_v51 }
 0x1f9   : > { %v1154_v53 = vadd.f32 %v1151_v52, %v1150_v51  ;;  %v1159_v55 = vmul.f32 %v1151_v52, %v1151_v52  ;;  %1153 = vst [vmem:[%s218_s11 + $0x8] sm:$0xff] %v1151_v52 }
 0x1fb   : > { %1155 = vadd.xlane.f32.xlu1 %v1154_v53  ;;  %v1160_v56 = vadd.f32 %v1159_v55, %v1158_v54 }
 0x1fd   : > { %1161 = vadd.xlane.f32.xlu0 %v1160_v56 }
 0x1fe   : > { %1419 = shalt.err (!%p1416_p3)
}
 0x1ff   : > { %s1420_s22 = scalar_lea.hbm %s1188_s15, 256  ;;  %s1424_s9 = scalar_lea.hbm %s1746_s3, 512 }
 0x200   : > { %p1421_p4 = scmp.ne.s32.totalorder %s1188_s15, %s1420_s22  ;;  %p1425_p9 = scmp.lt.s32.totalorder %s1188_s15, %s1746_s3 }
 0x201   : > { %p1426_p10 = scmp.lt.s32.totalorder %s1424_s9, %s1420_s22 }
 0x202   : > { %p1422_p7 = pnand %p1421_p4, %p1548_p5 }
 0x203   : > { %p1427_p11 = por %p1426_p10, %p1425_p9 }
 0x204   : > { %p1423_p8 = pneg %p1422_p7 }
 0x206   : > { %p1428_p12 = pnand %p1427_p11, %p1423_p8 }
 0x208   : > { %1431 = shalt.err (!%p1428_p12)
}
 0x209   : > { %1354 = dma.vmem_to_hbm [thread:$0]  (%p1548_p5), %s1191_s16, 256, %s1188_s15, %s1168_s17   ;;  %vm1164_vm15 = vcmask 7168  }
 0x20a   : > { %s239_s14 = scalar_lea.vmem %s1747_s4, %s1560_s6  ;;  %s243_s26 = scalar_lea.vmem %s1748_s5, %s1560_s6 }
 0x284   : > { %v1156_v57 = vpop.xlane.xlu1 %1155 }
 0x285   : > { %1165 = vst.msk [vmem:[%s239_s14] sm:$0xff] %vm1164_vm15, %v1156_v57 }
 0x286   : > { %v1162_v58 = vpop.xlane.xlu0 %1161 }
 0x287   : > { %1166 = vst.msk [vmem:[%s243_s26] sm:$0xff] %vm1164_vm15, %v1162_v58 }
 0x288 PF: > { %p1360_p13 = scmp.ge.s32.totalorder %s1466_s21, 2  ;;  %s1208_s28 = sand.u32 1, %s1454_s18  }
 0x289   : > { %s1209_s15 = scalar_lea.sflag [#allocation3], %s1208_s28 }
 0x28a   : > { %p1357_p5 = pnand %p1360_p13, %p1552_p6 }
 0x28c   : > { %p1358_p0 = pneg %p1357_p5 }
 0x28e   : > { %1449 = dma.done.wait (%p1358_p0), %s1209_s15, 256  }
 0x28f   : > { %1451 = vsyncadd (%p1358_p0), %s1209_s15, 4294967040  ;;  %p16_p1 = scmp.ge.s32.totalorder %s1535_s24, 4   ;;  %s1751_s18 = smov %s1458_s19 }
 0x290   : > { %s1752_s19 = smov %s1462_s20  ;;  %s1753_s20 = smov %s1546_s27 }
 0x291   : > { %s1754_s21 = smov %s1535_s24  ;;  %18 = sbr.rel (!%p16_p1) target bundleno = 3 (0x3), region = 99 }
 0x296   :  { %1228 = vsyncpa [#allocation3], 1 }
 0x297   :  { %1230 = vsyncpa [#allocation3 + $0x1], 1 }

</bundles_post_ra>
